<compile_context>
chip_gen: v5e
topology: v5e:2x2
jax: 0.10.0
libtpu: 0.0.40
codegen_flags: <defaults>
</compile_context>

<pallas_src>
import functools

import jax
import jax.numpy as jnp
import numpy as np
from jax.experimental import pallas as pl
from jax.experimental.pallas import tpu as pltpu

_LANES = 128
_SPLIT_THRESHOLD_BYTES = 512 << 10   # split into >= _MIN_GRID_STEPS above this
_MIN_GRID_STEPS = 4                  # >= 2 double-buffered steps per v7x core


def _sublane_multiple(dtypes):
    """Sublane alignment (8 for 4-byte, 16 for 2-byte, 32 for 1-byte dtypes)."""
    m = 8
    for dt in dtypes:
        itemsize = np.dtype(dt).itemsize
        m = max(m, 8 * max(1, 4 // itemsize))
    return m


@functools.lru_cache(maxsize=1)
def _device_kind():
    try:
        return (jax.devices()[0].device_kind or "").lower()
    except Exception:
        return ""


def _per_buffer_target_bytes(n_buffers):
    """Generation-aware per-buffer block byte target, VMEM-budgeted."""
    kind = _device_kind()
    if "v7" in kind:
        per_buf, budget = 4 << 20, 28 << 20   # 64 MiB physical / 32 MiB scoped default
    elif "v6" in kind:
        per_buf, budget = 2 << 20, 28 << 20   # 128 MiB physical / 32 MiB scoped default
    else:                                     # v5e & unknown: 16 MiB scoped default
        per_buf, budget = 1 << 20, 12 << 20
    # Double-buffered pipeline => total VMEM ~ 2 * n_buffers * per_buf.
    per_buf = min(per_buf, budget // max(1, 2 * n_buffers))
    return max(per_buf, 128 << 10)


def _plan_block_rows(rows, sub_mult, max_itemsize, n_buffers):
    """Pick block rows by byte target; independent of divisibility of rows."""
    target = _per_buffer_target_bytes(n_buffers)
    block_rows = max(sub_mult,
                     (target // (_LANES * max_itemsize)) // sub_mult * sub_mult)
    total_bytes = rows * _LANES * max_itemsize
    if total_bytes >= _SPLIT_THRESHOLD_BYTES and rows >= _MIN_GRID_STEPS * sub_mult:
        # Ensure at least _MIN_GRID_STEPS grid steps for megacore + pipelining.
        cap = max(sub_mult, (rows // _MIN_GRID_STEPS) // sub_mult * sub_mult)
        block_rows = min(block_rows, cap)
    if block_rows >= rows:
        return rows   # single block equal to full array dims (always legal)
    return block_rows


def _make_lambda_kernel(func, kinds, static_vals, scalar_dtypes):
    """Kernel body applying `func` to (x tile, reconstructed extra args)."""
    n_tensor = sum(k == "tensor" for k in kinds)
    n_scalar = sum(k == "scalar" for k in kinds)

    def kernel(*refs):
        # refs = (x_ref, tensor refs..., scalar SMEM refs..., o_ref)
        x_ref = refs[0]
        tensor_refs = refs[1:1 + n_tensor]
        scalar_refs = refs[1 + n_tensor:1 + n_tensor + n_scalar]
        o_ref = refs[1 + n_tensor + n_scalar]

        ti = si = pi = 0
        call_args = []
        for k in kinds:
            if k == "tensor":
                call_args.append(tensor_refs[ti][...]); ti += 1
            elif k == "scalar":
                # 32-bit scalar from SMEM, cast back to its original dtype;
                # broadcast happens on the VPU (no HBM materialization).
                call_args.append(scalar_refs[si][0].astype(scalar_dtypes[si]))
                si += 1
            else:  # static python value baked into the trace
                call_args.append(static_vals[pi]); pi += 1

        # Elementwise apply.  For the trailing partial block, rows past the
        # array end see padding/stale inputs and their writeback is dropped by
        # Pallas, so valid rows are unaffected.
        o_ref[...] = func(x_ref[...], *call_args).astype(o_ref.dtype)

    return kernel


class PallasLambdaLayer:
    """Pallas equivalent of LambdaLayer for elementwise jnp functions."""

    def __init__(self, function, donate_input=False):
        self._func = function
        # Opt-in only: aliasing forces XLA to treat x as donated; if the
        # caller still needs x it would insert a defensive copy (a full extra
        # HBM pass), so default is off.
        self._donate_input = donate_input

    def __call__(self, x, *args):
        x = jnp.asarray(x)
        orig_shape = x.shape
        n = int(x.size)
        if n == 0:   # degenerate: nothing to stream
            return jnp.asarray(self._func(x, *args))

        # ---- classify extra args (tensor / scalar / static python) -------
        kinds, tensor_args, static_args, abstract = [], [], [], []
        scalar_vals, scalar_dts = [], []
        for a in args:
            if isinstance(a, (bool, int, float)):
                kinds.append("static")
                static_args.append(a)
                abstract.append(a)
                continue
            a = jnp.asarray(a)
            is_float = jnp.issubdtype(a.dtype, jnp.floating)
            is_intlike = (jnp.issubdtype(a.dtype, jnp.integer)
                          or jnp.issubdtype(a.dtype, jnp.bool_))
            if a.size == 1 and (is_float or is_intlike):
                kinds.append("scalar")
                # SMEM holds 32-bit scalars: widen here, cast back in-kernel.
                wide = jnp.float32 if is_float else jnp.int32
                scalar_vals.append(a.reshape(1).astype(wide))
                scalar_dts.append(a.dtype)
                abstract.append(jax.ShapeDtypeStruct((), a.dtype))
            else:
                if a.shape != orig_shape:
                    # TODO(synk): broadcasting non-scalar args are materialized
                    # to full shape (extra HBM pass); a shape-preserving tiling
                    # would let them stream untiled from VMEM/SMEM instead.
                    a = jnp.broadcast_to(a, orig_shape)
                kinds.append("tensor")
                tensor_args.append(a)
                abstract.append(jax.ShapeDtypeStruct(orig_shape, a.dtype))

        # Output dtype follows the lambda's own promotion semantics.
        out_aval = jax.eval_shape(
            self._func, jax.ShapeDtypeStruct(orig_shape, x.dtype), *abstract)
        if out_aval.shape != orig_shape:
            raise ValueError(
                "PallasLambdaLayer only supports elementwise lambdas; func "
                f"mapped shape {orig_shape} -> {out_aval.shape}")
        out_dtype = out_aval.dtype

        # ---- lane-dense (rows, 128) view ----------------------------------
        all_dts = [x.dtype, out_dtype] + [t.dtype for t in tensor_args]
        sub_mult = _sublane_multiple(all_dts)
        max_itemsize = max(np.dtype(dt).itemsize for dt in all_dts)

        needs_pad = (n % _LANES) != 0
        rows = -(-n // _LANES)
        total = rows * _LANES

        def to_2d(a):
            flat = a.reshape(-1)
            if needs_pad:
                # TODO(synk): the sub-128 remainder costs one extra HBM pass
                # (jnp.pad copy + output slice); a manual-DMA tail path would
                # remove it, but typical NN numel is 128-divisible.
                flat = jnp.pad(flat, (0, total - n))
            return flat.reshape(rows, _LANES)

        x2d = to_2d(x)
        tensors2d = [to_2d(t) for t in tensor_args]

        # ---- byte-sized blocks, cdiv grid (masked tail handled by Pallas) --
        n_buffers = 2 + len(tensors2d)            # x + tensor args + out
        block_rows = _plan_block_rows(rows, sub_mult, max_itemsize, n_buffers)
        grid = (pl.cdiv(rows, block_rows),)

        tile_spec = pl.BlockSpec((block_rows, _LANES), lambda i: (i, 0))
        smem_spec = pl.BlockSpec(memory_space=pltpu.MemorySpace.SMEM)

        kernel = _make_lambda_kernel(self._func, tuple(kinds),
                                     tuple(static_args), tuple(scalar_dts))

        # Double-buffered VMEM footprint of all streamed buffers + headroom.
        dbuf_bytes = 2 * block_rows * _LANES * sum(
            np.dtype(dt).itemsize for dt in all_dts)
        vmem_limit = int(min(max(dbuf_bytes + (16 << 20), 32 << 20), 48 << 20))

        io_aliases = {}
        if self._donate_input and not needs_pad and out_dtype == x.dtype:
            io_aliases = {0: 0}

        out2d = pl.pallas_call(
            kernel,
            out_shape=jax.ShapeDtypeStruct((rows, _LANES), out_dtype),
            grid_spec=pltpu.PrefetchScalarGridSpec(
                num_scalar_prefetch=0,
                grid=grid,
                in_specs=[tile_spec] * (1 + len(tensors2d))
                         + [smem_spec] * len(scalar_vals),
                out_specs=tile_spec,
            ),
            compiler_params=pltpu.CompilerParams(
                dimension_semantics=("parallel",),
                vmem_limit_bytes=vmem_limit),
            input_output_aliases=io_aliases,
        )(x2d, *tensors2d, *scalar_vals)

        if needs_pad:
            return out2d.reshape(-1)[:n].reshape(orig_shape)
        return out2d.reshape(orig_shape)


if __name__ == "__main__":
    key = jax.random.PRNGKey(0)
    k0, k1, k2, k3 = jax.random.split(key, 4)

    # 1) NCHW activations consistent with typical LambdaLayer usage:
    #    batch=2, channels=4, spatial=16x16.  Scaled residual add with a
    #    traced scalar (SMEM path).
    x = jax.random.normal(k0, (2, 4, 16, 16), dtype=jnp.float32)
    y = jax.random.normal(k1, (2, 4, 16, 16), dtype=jnp.float32)
    scale = jnp.asarray(1.5, dtype=jnp.float32)
    layer = PallasLambdaLayer(lambda a, b, s: s * a + b)
    out = jax.block_until_ready(layer(x, y, scale))
    ref = scale * x + y
    assert out.shape == ref.shape and out.dtype == ref.dtype
    assert jnp.allclose(out, ref, atol=1e-6, rtol=1e-6)

    # 2) Ragged numel (not a multiple of 128): exercises the minimal pad path.
    z = jax.random.normal(k0, (3, 5, 7), dtype=jnp.float32)
    layer2 = PallasLambdaLayer(lambda a: 2.0 * a + 1.0)
    out2 = jax.block_until_ready(layer2(z))
    ref2 = 2.0 * z + 1.0
    assert out2.shape == ref2.shape and out2.dtype == ref2.dtype
    assert jnp.allclose(out2, ref2, atol=1e-6, rtol=1e-6)

    # 3) Mid-size tensor with a row count that is NOT a multiple of the block:
    #    exercises the multi-step cdiv grid + clamped tail block (no pad/slice).
    a3 = jax.random.normal(k2, (2, 3, 550, 128), dtype=jnp.float32)
    b3 = jax.random.normal(k3, (2, 3, 550, 128), dtype=jnp.float32)
    layer3 = PallasLambdaLayer(lambda a, b: jnp.maximum(a, 0.0) + 0.5 * b)
    out3 = jax.block_until_ready(layer3(a3, b3))
    ref3 = jnp.maximum(a3, 0.0) + 0.5 * b3
    assert out3.shape == ref3.shape and out3.dtype == ref3.dtype
    assert jnp.allclose(out3, ref3, atol=1e-6, rtol=1e-6)

    print("KERNEL_OK")
</pallas_src>

<mosaic_0001>
module attributes {stable_mosaic.version = 11 : i64} {
  func.func @kernel(%arg0: i32, %arg1: memref<16x128xf32, #tpu.memory_space<vmem>>, %arg2: memref<16x128xf32, #tpu.memory_space<vmem>>, %arg3: memref<1xf32, #tpu.memory_space<smem>>, %arg4: memref<16x128xf32, #tpu.memory_space<vmem>>) attributes {dimension_semantics = [#tpu.dimension_semantics<parallel>], iteration_bounds = array<i64: 1>, scalar_prefetch = 0 : i64, scratch_operands = 0 : i64, tpu.core_type = #tpu.core_type<tc>, window_params = [{transform_indices = @transform_0, window_bounds = array<i64: 16, 128>}, {transform_indices = @transform_1, window_bounds = array<i64: 16, 128>}, {transform_indices = @transform_2, window_bounds = array<i64: 1>}, {transform_indices = @transform_3, window_bounds = array<i64: 16, 128>}]} {
    %c0 = arith.constant 0 : index
    %c0_0 = arith.constant 0 : index
    %0 = vector.load %arg2[%c0, %c0_0] : memref<16x128xf32, #tpu.memory_space<vmem>>, vector<16x128xf32>
    %c0_1 = arith.constant 0 : index
    %1 = memref.load %arg3[%c0_1] : memref<1xf32, #tpu.memory_space<smem>>
    %c0_2 = arith.constant 0 : index
    %c0_3 = arith.constant 0 : index
    %2 = vector.load %arg1[%c0_2, %c0_3] : memref<16x128xf32, #tpu.memory_space<vmem>>, vector<16x128xf32>
    %3 = vector.broadcast %1 : f32 to vector<16x128xf32>
    %4 = arith.mulf %3, %2 : vector<16x128xf32>
    %5 = arith.addf %4, %0 : vector<16x128xf32>
    %c0_4 = arith.constant 0 : index
    %c0_5 = arith.constant 0 : index
    %6 = vector.load %arg4[%c0_4, %c0_5] : memref<16x128xf32, #tpu.memory_space<vmem>>, vector<16x128xf32>
    tpu.vector_store %arg4[%c0_4, %c0_5], %5 {strides = array<i32>} : memref<16x128xf32, #tpu.memory_space<vmem>>, vector<16x128xf32>,
    return
  }
  func.func @transform_0(%arg0: i32) -> (i32, i32) {
    %c0_i32 = arith.constant 0 : i32
    %c0_i32_0 = arith.constant 0 : i32
    return %arg0, %c0_i32 : i32, i32
  }
  func.func @transform_1(%arg0: i32) -> (i32, i32) {
    %c0_i32 = arith.constant 0 : i32
    %c0_i32_0 = arith.constant 0 : i32
    return %arg0, %c0_i32 : i32, i32
  }
  func.func @transform_2(%arg0: i32) -> i32 {
    %c0_i32 = arith.constant 0 : i32
    %c0_i32_0 = arith.constant 0 : i32
    return %c0_i32 : i32
  }
  func.func @transform_3(%arg0: i32) -> (i32, i32) {
    %c0_i32 = arith.constant 0 : i32
    %c0_i32_0 = arith.constant 0 : i32
    return %arg0, %c0_i32 : i32, i32
  }
}

</mosaic_0001>

<bundles_post_ra>
// kernel: tpu_custom_call.1
= control target key start
LH: loop header
LB: loop body
LE: loop exit
PB: predicated region body
PF: predicated region fallthrough
CT: control target
= control target key end

     0   :  { %9 = vsyncpa [#allocation4], 0  ;;  %s209_s0 = inlined_call_operand.hbm [shape: f32[16,128], index: 0, kind: input, shape index: {}]   ;;  %s210_s1 = inlined_call_operand.hbm [shape: f32[16,128], index: 1, kind: input, shape index: {}]   ;;  %s211_s2 = inlined_call_operand.<no memory space> [shape: f32[1], index: 2, kind: input, shape index: {}]   ;;  %s212_s3 = inlined_call_operand.hbm [shape: f32[16,128], index: 3, kind: output, shape index: {}]  }
   0x1   :  { %10 = vsyncpa [#allocation7], 0 }
   0x2   :  { %11 = vsyncpa [#allocation5], 0  ;;  %s16_s14 = sshll.u32 %s209_s0, 4  ;;  %s163_s15 = smov [#allocation3]   ;;  %s17_s14 = int_to_ptr.hbm [resolvable:$true] %s16_s14 }
   0x3   :  { %s18_s16 = sshll.u32 %s163_s15, 4  ;;  %s29_s19 = sshll.u32 %s210_s1, 4  ;;  %s19_s16 = int_to_ptr.vmem [resolvable:$true] %s18_s16  ;;  %s30_s19 = int_to_ptr.hbm [resolvable:$true] %s29_s19 }
   0x4   :  { %s164_s20 = smov 128   ;;  %s165_s21 = smov 8  }
   0x5   :  { %24 = dma.hbm_to_vmem [thread:$0]  %s17_s14, 256, %s19_s16, [#allocation4], %s164_s20, %s164_s20, %s165_s21  }
   0x6   :  { %s166_s22 = smov [#allocation6]  }
   0x7   :  { %s31_s23 = sshll.u32 %s166_s22, 4  ;;  %s32_s23 = int_to_ptr.vmem [resolvable:$true] %s31_s23 }
   0x8   :  { %37 = dma.hbm_to_vmem [thread:$0]  %s30_s19, 256, %s32_s23, [#allocation7], %s164_s20, %s164_s20, %s165_s21  }
   0x9   :  { %157 = dma.done.wait [#allocation4], 256  }
   0xa   :  { %158 = vsyncadd [#allocation4], 4294967040 }
   0xb   :  { %159 = dma.done.wait [#allocation7], 256  }
   0xc   :  { %160 = vsyncadd [#allocation7], 4294967040  ;;  %v53_v0 = vstv %s211_s2  ;;  %v48_v1 = vld [vmem:[#allocation6] sm:$0xff]  ;;  %v51_v2 = vld [vmem:[#allocation3] sm:$0xff]  ;;  %s167_s24 = smov [#allocation8]   ;;  %s66_s28 = sshll.u32 %s212_s3, 4  ;;  %s67_s28 = int_to_ptr.hbm [resolvable:$true] %s66_s28 }
   0xd   :  { %v54_v3 = vmul.f32 %v53_v0, %v51_v2  ;;  %v49_v4 = vld [vmem:[#allocation6 + $0x8] sm:$0xff]  ;;  %v52_v5 = vld [vmem:[#allocation3 + $0x8] sm:$0xff]  ;;  %s64_s25 = sshll.u32 %s167_s24, 4  ;;  %s65_s25 = int_to_ptr.vmem [resolvable:$true] %s64_s25 }
   0xe   :  { %v55_v6 = vmul.f32 %v53_v0, %v52_v5 }
   0xf   :  { %v56_v7 = vadd.f32 %v54_v3, %v48_v1 }
  0x10   :  { %v57_v8 = vadd.f32 %v55_v6, %v49_v4 }
  0x11   :  { %58 = vst [vmem:[#allocation8] sm:$0xff] %v56_v7 }
  0x12   :  { %59 = vst [vmem:[#allocation8 + $0x8] sm:$0xff] %v57_v8 }
  0x13   :  { %72 = dma.vmem_to_hbm [thread:$0]  %s65_s25, 256, %s67_s28, [#allocation5], %s164_s20, %s164_s20, %s165_s21  }
  0x14   :  { %161 = dma.done.wait [#allocation5], 256  }
  0x15   :  { %162 = vsyncadd [#allocation5], 4294967040 }
  0x16   :  { %77 = vsyncpa [#allocation4], 1 }
  0x17   :  { %78 = vsyncpa [#allocation7], 1 }
  0x18   :  { %79 = vsyncpa [#allocation5], 1 }

</bundles_post_ra>
